<compile_context>
chip_gen: v5e
topology: v5e:2x2
jax: 0.10.0
libtpu: 0.0.40
codegen_flags: <defaults>
</compile_context>

<pallas_src>
import functools
import math

import jax
import jax.numpy as jnp
from jax.experimental import pallas as pl
from jax.experimental.pallas import tpu as pltpu


TILE_DST = 128            # dst rows per grid step (128 is safe on v5e/v7x; 256 viable on v6e)
TILE_SRC = 512            # src cols per grid step (raise to 1024-2048 on v6e, keep small on v7x)
VMEM_LIMIT = 48 * 1024 * 1024   # <= v7x 64 MiB physical; well under v5e/v6e 128 MiB


def _round_up(x, m):
    return (x + m - 1) // m * m


# ----------------------------------------------------------------------------
# Kernel 1: projection + attention scores (per node tile), lane-dense scores
# ----------------------------------------------------------------------------
def gat_project_kernel(h_ref, w_ref, amat_ref, feat_ref, el_ref, er_ref):
    # h:    (T, Fin)   f32    node features for this node tile
    # w:    (Fin, HD)  bf16   projection weight (resident)
    # amat: (HD, SC)   f32    block-diag attention matrix; cols [0:H]=el, [H:2H]=er
    # feat: (T, HD)    bf16   OUT projected features (MXU operand for kernel 2)
    # el:   (H, T)     f32    OUT source scores, lane-dense (nodes on lanes)
    # er:   (H, T)     f32    OUT destination scores, lane-dense
    H = el_ref.shape[0]
    h = h_ref[...].astype(jnp.bfloat16)                                  # cast at MXU boundary
    feat = jnp.dot(h, w_ref[...], preferred_element_type=jnp.float32)    # (T, HD) f32
    feat_ref[...] = feat.astype(jnp.bfloat16)
    scores = jnp.dot(feat, amat_ref[...],
                     preferred_element_type=jnp.float32)                 # (T, SC)
    st = scores.T                                  # one tiny (T, SC)->(SC, T) transpose per tile
    el_ref[...] = st[:H, :]
    er_ref[...] = st[H:2 * H, :]


# ----------------------------------------------------------------------------
# Kernel 2: masked attention + aggregation, online softmax over src tiles
# ----------------------------------------------------------------------------
def gat_attend_kernel(nnz_ref, adj_ref, el_ref, er_ref, feat_ref, b_ref, out_ref,
                      m_sc, l_sc, acc_sc, *, num_heads, out_feats, activation):
    # nnz:  (nd*ns,)   int32 SMEM   edge count per (dst_tile, src_tile) adjacency block
    # adj:  (Td, Ts)   int8         adj[dst, src] block
    # el:   (H, Ts)    f32          source scores for this src tile
    # er:   (H, Td)    f32          destination scores for this dst tile
    # feat: (Ts, HD)   bf16         projected features for this src tile
    # b:    (1, HD)    f32          bias (head-major flattened)
    # out:  (Td, HD)   f32          written on the last src step (lane-dense)
    # scratch: m (H,Td,1), l (H,Td,1), acc (H,Td,HD)  -- online-softmax state
    H, D = num_heads, out_feats
    HD = H * D
    i = pl.program_id(0)
    j = pl.program_id(1)
    ns = pl.num_programs(1)
    Td, Ts = adj_ref.shape

    @pl.when(j == 0)
    def _init():
        m_sc[...] = jnp.full_like(m_sc, -jnp.inf)
        l_sc[...] = jnp.zeros_like(l_sc)
        acc_sc[...] = jnp.zeros_like(acc_sc)

    @pl.when(nnz_ref[i * ns + j] > 0)          # skip empty adjacency blocks entirely
    def _compute():
        # additive mask built ONCE per block (no per-head select across H)
        mbias = jnp.where(adj_ref[...] != 0, 0.0, -1e30)               # (Td, Ts) f32
        # e[h, dst, src] = leaky_relu(er[h,dst] + el[h,src], slope 0.2) + mask
        s = er_ref[...][:, :, None] + el_ref[...][:, None, :]          # (H, Td, Ts)
        s = jnp.where(s > 0, s, 0.2 * s)
        e = s + mbias[None, :, :]
        # online softmax (f32 max / denom for accuracy; v5e has no bf16 VPU)
        m_prev = m_sc[...]
        m_new = jnp.maximum(m_prev, jnp.max(e, axis=-1, keepdims=True))
        alpha = jnp.exp(m_prev - m_new)                                # (H, Td, 1)
        p = jnp.exp(e - m_new)                                         # masked -> 0
        l_sc[...] = alpha * l_sc[...] + jnp.sum(p, axis=-1, keepdims=True)
        m_sc[...] = m_new
        # head-batched bf16 MXU aggregation against the full-width feat slab;
        # leading-dim reshapes are layout no-ops (lane dim unchanged).
        p2 = p.reshape(H * Td, Ts).astype(jnp.bfloat16)
        contrib = jnp.dot(p2, feat_ref[...],
                          preferred_element_type=jnp.float32).reshape(H, Td, HD)
        acc_sc[...] = alpha * acc_sc[...] + contrib

    @pl.when(j == ns - 1)
    def _finalize():
        # deferred normalization on H*Td*HD elements (not H*Td*N); EUP reciprocal
        inv = pl.reciprocal(jnp.maximum(l_sc[...], 1e-20), approx=True)  # (H, Td, 1)
        # keep head h's D-wide column block, sum heads -> lane-dense (Td, HD)
        hh = jax.lax.broadcasted_iota(jnp.int32, (H, HD), 0)
        cc = jax.lax.broadcasted_iota(jnp.int32, (H, HD), 1)
        head_mask = (cc // D == hh).astype(jnp.float32)                  # (H, HD)
        out = jnp.sum(acc_sc[...] * (inv * head_mask[:, None, :]), axis=0)
        out = out + b_ref[...]
        if activation == "elu":
            out = jnp.where(out > 0, out, jnp.expm1(out))
        elif activation == "sigmoid":
            out = jax.nn.sigmoid(out)
        out_ref[...] = out


# ----------------------------------------------------------------------------
# One GATConv layer (wrapper: tiling, padding, block-nnz map)
# ----------------------------------------------------------------------------
def gat_conv(h, w, al, ar, b, adj_i8, *, num_heads, out_feats, activation):
    n, fin = h.shape
    H, D = num_heads, out_feats
    HD = H * D

    tile_d = TILE_DST
    n_pad = _round_up(n, tile_d)
    tile_s = min(TILE_SRC, n_pad)
    n_pad = _round_up(n_pad, tile_s)
    if n_pad != n:
        h = jnp.pad(h, ((0, n_pad - n), (0, 0)))
        adj_i8 = jnp.pad(adj_i8, ((0, n_pad - n), (0, n_pad - n)))
    nd, ns = n_pad // tile_d, n_pad // tile_s

    w_bf = w.astype(jnp.bfloat16)

    # block-diag attention matrix (HD, SC): feat @ a_mat -> [el | er | 0-pad]
    SC = _round_up(2 * H, 8)
    eye = jnp.eye(H, dtype=jnp.float32)
    a_l = (al[:, :, None] * eye[:, None, :]).reshape(HD, H)
    a_r = (ar[:, :, None] * eye[:, None, :]).reshape(HD, H)
    a_mat = jnp.concatenate(
        [a_l, a_r, jnp.zeros((HD, SC - 2 * H), jnp.float32)], axis=1)

    # ---- kernel 1: projection + lane-dense scores ---------------------------
    feat, el_t, er_t = pl.pallas_call(
        gat_project_kernel,
        grid=(n_pad // tile_d,),
        in_specs=[
            pl.BlockSpec((tile_d, fin), lambda i: (i, 0)),
            pl.BlockSpec((fin, HD), lambda i: (0, 0)),         # resident
            pl.BlockSpec((HD, SC), lambda i: (0, 0)),          # resident
        ],
        out_specs=[
            pl.BlockSpec((tile_d, HD), lambda i: (i, 0)),
            pl.BlockSpec((H, tile_d), lambda i: (0, i)),
            pl.BlockSpec((H, tile_d), lambda i: (0, i)),
        ],
        out_shape=[
            jax.ShapeDtypeStruct((n_pad, HD), jnp.bfloat16),
            jax.ShapeDtypeStruct((H, n_pad), jnp.float32),
            jax.ShapeDtypeStruct((H, n_pad), jnp.float32),
        ],
        compiler_params=pltpu.CompilerParams(
            dimension_semantics=("parallel",),
            vmem_limit_bytes=VMEM_LIMIT),
    )(h, w_bf, a_mat)

    # per-(dst_tile, src_tile) edge counts -> skip empty adjacency blocks
    blk_nnz = (adj_i8.reshape(nd, tile_d, ns, tile_s)
               .astype(jnp.int32).sum(axis=(1, 3)).reshape(-1))    # (nd*ns,) int32

    b_flat = b.reshape(1, HD).astype(jnp.float32)

    kernel = functools.partial(gat_attend_kernel, num_heads=H, out_feats=D,
                               activation=activation)

    # ---- kernel 2: masked attention + aggregation ----------------------------
    out = pl.pallas_call(
        kernel,
        grid_spec=pltpu.PrefetchScalarGridSpec(
            num_scalar_prefetch=1,
            grid=(nd, ns),
            in_specs=[
                pl.BlockSpec((tile_d, tile_s), lambda i, j, nnz: (i, j)),   # adj
                pl.BlockSpec((H, tile_s), lambda i, j, nnz: (0, j)),        # el (src)
                pl.BlockSpec((H, tile_d), lambda i, j, nnz: (0, i)),        # er (dst)
                pl.BlockSpec((tile_s, HD), lambda i, j, nnz: (j, 0)),       # feat (src)
                pl.BlockSpec((1, HD), lambda i, j, nnz: (0, 0)),            # bias
            ],
            out_specs=pl.BlockSpec((tile_d, HD), lambda i, j, nnz: (i, 0)),
            scratch_shapes=[
                pltpu.VMEM((H, tile_d, 1), jnp.float32),   # running max
                pltpu.VMEM((H, tile_d, 1), jnp.float32),   # running denom
                pltpu.VMEM((H, tile_d, HD), jnp.float32),  # per-head accumulator
            ]),
        out_shape=jax.ShapeDtypeStruct((n_pad, HD), jnp.float32),
        compiler_params=pltpu.CompilerParams(
            dimension_semantics=("parallel", "arbitrary"),
            vmem_limit_bytes=VMEM_LIMIT),
    )(blk_nnz, adj_i8, el_t, er_t, feat, b_flat)

    return out[:n]


# ----------------------------------------------------------------------------
# Parameter init + full GAT forward (glue in plain JAX)
# ----------------------------------------------------------------------------
def init_gat_params(key, in_feats, n_hidden, n_classes, n_layers, heads):
    dims = [(in_feats, n_hidden, heads[0])]                   # first layer
    for _ in range(n_layers - 2):                             # hidden layers
        dims.append((n_hidden * heads[0], n_hidden, heads[0]))
    dims.append((n_hidden * heads[0], n_classes, heads[1]))   # output layer

    params = []
    for (fin, fout, h) in dims:
        key, k1, k2, k3 = jax.random.split(key, 4)
        scale = math.sqrt(2.0 / fin)
        params.append(dict(
            w=(jax.random.normal(k1, (fin, h * fout)) * scale).astype(jnp.float32),
            al=(jax.random.normal(k2, (h, fout)) * 0.1).astype(jnp.float32),
            ar=(jax.random.normal(k3, (h, fout)) * 0.1).astype(jnp.float32),
            b=jnp.zeros((h, fout), jnp.float32),
            heads=h, out_feats=fout,
        ))
    return params


def gat_forward(adj_i8, inputs, params):
    h = inputs.astype(jnp.float32)
    n_layers = len(params)
    for i, p in enumerate(params):
        act = "sigmoid" if i == n_layers - 1 else "elu"
        out = gat_conv(h, p["w"], p["al"], p["ar"], p["b"], adj_i8,
                       num_heads=p["heads"], out_feats=p["out_feats"],
                       activation=act)
        if i == n_layers - 1:
            h = out.reshape(out.shape[0], p["heads"], p["out_feats"]).mean(axis=1)
        else:
            h = out                                           # flatten(1): already (N, H*D)
    return h


# ----------------------------------------------------------------------------
# Pure-JAX reference (same math, mimics bf16 MXU casts) for correctness
# ----------------------------------------------------------------------------
def gat_conv_ref(h, w, al, ar, b, adj, *, num_heads, out_feats, activation):
    n = h.shape[0]
    H, D = num_heads, out_feats
    feat_f32 = jnp.dot(h.astype(jnp.bfloat16), w.astype(jnp.bfloat16),
                       preferred_element_type=jnp.float32)
    feat3 = feat_f32.reshape(n, H, D)
    el = jnp.einsum("nhd,hd->nh", feat3, al)
    er = jnp.einsum("nhd,hd->nh", feat3, ar)
    s = er[:, None, :] + el[None, :, :]                       # (dst, src, H)
    s = jnp.where(s > 0, s, 0.2 * s)
    mask = (adj != 0)[:, :, None]
    e = jnp.where(mask, s, -1e30)
    p = jnp.exp(e - jnp.max(e, axis=1, keepdims=True))
    denom = jnp.sum(p, axis=1)                                # (dst, H)
    feat_bf = feat_f32.astype(jnp.bfloat16).reshape(n, H, D)
    agg = jnp.einsum("ijh,jhd->ihd", p.astype(jnp.bfloat16), feat_bf,
                     preferred_element_type=jnp.float32)      # (dst, H, D)
    out = agg / jnp.maximum(denom[:, :, None], 1e-20) + b[None]
    if activation == "elu":
        out = jnp.where(out > 0, out, jnp.expm1(out))
    else:
        out = jax.nn.sigmoid(out)
    return out.reshape(n, H * D)


def gat_forward_ref(adj, inputs, params):
    h = inputs.astype(jnp.float32)
    n_layers = len(params)
    for i, p in enumerate(params):
        act = "sigmoid" if i == n_layers - 1 else "elu"
        out = gat_conv_ref(h, p["w"], p["al"], p["ar"], p["b"], adj,
                           num_heads=p["heads"], out_feats=p["out_feats"],
                           activation=act)
        if i == n_layers - 1:
            h = out.reshape(out.shape[0], p["heads"], p["out_feats"]).mean(axis=1)
        else:
            h = out
    return h


if __name__ == "__main__":
    key = jax.random.PRNGKey(0)
    k_x, k_adj, k_par = jax.random.split(key, 3)

    # Small synthetic problem: N=1000 nodes (exercises padding to 1024, 8 dst
    # tiles x 2 src tiles), in_feats=64, n_hidden=16, n_classes=8, n_layers=3,
    # heads=[8, 1] -> hidden H*D = 128 (lane-dense output slab).
    N, IN_FEATS, N_HIDDEN, N_CLASSES, N_LAYERS = 1000, 64, 16, 8, 3
    HEADS = [8, 1]

    x = jax.random.normal(k_x, (N, IN_FEATS), dtype=jnp.float32)

    # Banded random digraph + self loops; adj[dst, src] as int8. Off-band
    # adjacency blocks are all-zero, exercising the sparse block-skip path.
    idx = jnp.arange(N)
    band = jnp.abs(idx[:, None] - idx[None, :]) <= 96
    rnd = jax.random.uniform(k_adj, (N, N)) < 0.3
    adj = jnp.where(band & rnd, 1, 0)
    adj = jnp.maximum(adj, jnp.eye(N, dtype=adj.dtype))       # self loops (required)
    adj_i8 = adj.astype(jnp.int8)

    params = init_gat_params(k_par, IN_FEATS, N_HIDDEN, N_CLASSES, N_LAYERS, HEADS)

    out = gat_forward(adj_i8, x, params)
    out = jax.block_until_ready(out)
    assert out.shape == (N, N_CLASSES), out.shape

    ref = gat_forward_ref(adj_i8, x, params)
    err = float(jnp.max(jnp.abs(out - ref)))
    assert err < 2e-2, err

    print("KERNEL_OK")
</pallas_src>

<mosaic_0001>
module attributes {stable_mosaic.version = 11 : i64} {
  func.func @gat_project_kernel(%arg0: i32, %arg1: memref<128x64xf32, #tpu.memory_space<vmem>>, %arg2: memref<64x128xbf16, #tpu.memory_space<vmem>>, %arg3: memref<128x16xf32, #tpu.memory_space<vmem>>, %arg4: memref<128x128xbf16, #tpu.memory_space<vmem>>, %arg5: memref<8x128xf32, #tpu.memory_space<vmem>>, %arg6: memref<8x128xf32, #tpu.memory_space<vmem>>) attributes {dimension_semantics = [#tpu.dimension_semantics<parallel>], iteration_bounds = array<i64: 8>, scalar_prefetch = 0 : i64, scratch_operands = 0 : i64, tpu.core_type = #tpu.core_type<tc>, window_params = [{transform_indices = @transform_0, window_bounds = array<i64: 128, 64>}, {pipeline_mode = #tpu.pipeline_mode<synchronous>, transform_indices = @transform_1, window_bounds = array<i64: 64, 128>}, {pipeline_mode = #tpu.pipeline_mode<synchronous>, transform_indices = @transform_2, window_bounds = array<i64: 128, 16>}, {transform_indices = @transform_3, window_bounds = array<i64: 128, 128>}, {transform_indices = @transform_4, window_bounds = array<i64: 8, 128>}, {transform_indices = @transform_5, window_bounds = array<i64: 8, 128>}]} {
    %c0 = arith.constant 0 : index
    %c0_0 = arith.constant 0 : index
    %0 = vector.load %arg1[%c0, %c0_0] : memref<128x64xf32, #tpu.memory_space<vmem>>, vector<128x64xf32>
    %1 = arith.truncf %0 : vector<128x64xf32> to vector<128x64xbf16>
    %c0_1 = arith.constant 0 : index
    %c0_2 = arith.constant 0 : index
    %2 = vector.load %arg2[%c0_1, %c0_2] : memref<64x128xbf16, #tpu.memory_space<vmem>>, vector<64x128xbf16>
    %cst = arith.constant dense<0.000000e+00> : vector<128x128xf32>
    %3 = tpu.matmul %1, %2, %cst {dimension_numbers = #tpu.dot_dimension_numbers<[1], [0], [0], [1], [0, 0, 1, 1], [], []>} : vector<128x64xbf16>, vector<64x128xbf16>, vector<128x128xf32> -> vector<128x128xf32>
    %4 = arith.truncf %3 : vector<128x128xf32> to vector<128x128xbf16>
    %c0_3 = arith.constant 0 : index
    %c0_4 = arith.constant 0 : index
    %5 = vector.load %arg4[%c0_3, %c0_4] : memref<128x128xbf16, #tpu.memory_space<vmem>>, vector<128x128xbf16>
    tpu.vector_store %arg4[%c0_3, %c0_4], %4 {strides = array<i32>} : memref<128x128xbf16, #tpu.memory_space<vmem>>, vector<128x128xbf16>,
    %c0_5 = arith.constant 0 : index
    %c0_6 = arith.constant 0 : index
    %6 = vector.load %arg3[%c0_5, %c0_6] : memref<128x16xf32, #tpu.memory_space<vmem>>, vector<128x16xf32>
    %cst_7 = arith.constant dense<0.000000e+00> : vector<128x16xf32>
    %7 = tpu.matmul %3, %6, %cst_7 {dimension_numbers = #tpu.dot_dimension_numbers<[1], [0], [0], [1], [0, 0, 1, 1], [], []>} : vector<128x128xf32>, vector<128x16xf32>, vector<128x16xf32> -> vector<128x16xf32>
    %8 = tpu.transpose %7, [1, 0] : vector<128x16xf32> -> vector<16x128xf32>
    %9 = vector.extract_strided_slice %8 {offsets = [0, 0], sizes = [8, 128], strides = [1, 1]} : vector<16x128xf32> to vector<8x128xf32>
    %c0_8 = arith.constant 0 : index
    %c0_9 = arith.constant 0 : index
    %10 = vector.load %arg5[%c0_8, %c0_9] : memref<8x128xf32, #tpu.memory_space<vmem>>, vector<8x128xf32>
    tpu.vector_store %arg5[%c0_8, %c0_9], %9 {strides = array<i32>} : memref<8x128xf32, #tpu.memory_space<vmem>>, vector<8x128xf32>,
    %11 = vector.extract_strided_slice %8 {offsets = [8, 0], sizes = [8, 128], strides = [1, 1]} : vector<16x128xf32> to vector<8x128xf32>
    %c0_10 = arith.constant 0 : index
    %c0_11 = arith.constant 0 : index
    %12 = vector.load %arg6[%c0_10, %c0_11] : memref<8x128xf32, #tpu.memory_space<vmem>>, vector<8x128xf32>
    tpu.vector_store %arg6[%c0_10, %c0_11], %11 {strides = array<i32>} : memref<8x128xf32, #tpu.memory_space<vmem>>, vector<8x128xf32>,
    return
  }
  func.func @transform_0(%arg0: i32) -> (i32, i32) {
    %c0_i32 = arith.constant 0 : i32
    %c0_i32_0 = arith.constant 0 : i32
    return %arg0, %c0_i32 : i32, i32
  }
  func.func @transform_1(%arg0: i32) -> (i32, i32) {
    %c0_i32 = arith.constant 0 : i32
    %c0_i32_0 = arith.constant 0 : i32
    %c0_i32_1 = arith.constant 0 : i32
    return %c0_i32, %c0_i32_0 : i32, i32
  }
  func.func @transform_2(%arg0: i32) -> (i32, i32) {
    %c0_i32 = arith.constant 0 : i32
    %c0_i32_0 = arith.constant 0 : i32
    %c0_i32_1 = arith.constant 0 : i32
    return %c0_i32, %c0_i32_0 : i32, i32
  }
  func.func @transform_3(%arg0: i32) -> (i32, i32) {
    %c0_i32 = arith.constant 0 : i32
    %c0_i32_0 = arith.constant 0 : i32
    return %arg0, %c0_i32 : i32, i32
  }
  func.func @transform_4(%arg0: i32) -> (i32, i32) {
    %c0_i32 = arith.constant 0 : i32
    %c0_i32_0 = arith.constant 0 : i32
    return %c0_i32, %arg0 : i32, i32
  }
  func.func @transform_5(%arg0: i32) -> (i32, i32) {
    %c0_i32 = arith.constant 0 : i32
    %c0_i32_0 = arith.constant 0 : i32
    return %c0_i32, %arg0 : i32, i32
  }
}

</mosaic_0001>

<bundles_post_ra>
// kernel: tpu_custom_call.1
= control target key start
LH: loop header
LB: loop body
LE: loop exit
PB: predicated region body
PF: predicated region fallthrough
CT: control target
= control target key end

     0   :  { %11 = vsyncpa [#allocation3], 0  ;;  %s1260_s0 = inlined_call_operand.vmem [shape: f32[1024,64], index: 0, kind: input, shape index: {}]   ;;  %s1261_s1 = inlined_call_operand.vmem [shape: bf16[64,128], index: 1, kind: input, shape index: {}]   ;;  %s1262_s2 = inlined_call_operand.vmem [shape: f32[128,16], index: 2, kind: input, shape index: {}]   ;;  %s1263_s3 = inlined_call_operand.hbm [shape: bf16[1024,128], index: 3, kind: output, shape index: {0}]   ;;  %s1264_s4 = inlined_call_operand.hbm [shape: f32[8,1024], index: 4, kind: output, shape index: {1}]   ;;  %s1265_s5 = inlined_call_operand.hbm [shape: f32[8,1024], index: 5, kind: output, shape index: {2}]  }
   0x1   :  { %13 = vsyncpa [#allocation3 + $0x1], 0 }
   0x2   :  { %14 = vsyncpa [#allocation5], 0 }
   0x3   :  { %16 = vsyncpa [#allocation5 + $0x1], 0  ;;  %s1038_s18 = smov 0   ;;  %s1040_s19 = smov 0  }
   0x4   :  { %s1042_s20 = smov 0   ;;  %s1044_s21 = smov 0  }
   0x5 LB: > { %s1059_s22 = sadd.s32 4294967295, %s1004_s21   ;;  %s1266_s23 = sadd.s32 4294967294, %s1004_s21   ;;  %s1004_s21 = sphi %s1044_s21, %s1273_s21   ;;  %s1000_s20 = sphi %s1042_s20, %s1272_s20   ;;  %s996_s19 = sphi %s1040_s19, %s1271_s19   ;;  %s992_s18 = sphi %s1038_s18, %s1270_s18  }
   0x6   : > { %s1063_s24 = sadd.s32 1, %s1004_s21   ;;  %s97_s25 = sadd.s32 1, %s1000_s20 }
   0x7   : > { %s94_s26 = ssub.s32 %s1004_s21, %s1063_s24  ;;  %p107_p0 = scmp.ne.s32.totalorder %s1000_s20, %s996_s19 }
   0x8   : > { %p95_p1 = scmp.eq.s32.totalorder %s94_s26, 0  ;;  %p108_p2 = scmp.eq.s32.totalorder %s1059_s22, 7 }
   0x9   : > { %p113_p3 = scmp.ne.s32.totalorder %s996_s19, %s992_s18  ;;  %p114_p4 = scmp.eq.s32.totalorder %s1266_s23, 7 }
   0xa   : > { %s1076_s27 = scalar_select %p95_p1, %s1000_s20, %s97_s25  }
   0xb   : > { %p1078_p5 = por %p108_p2, %p107_p0  ;;  %p1082_p6 = por %p114_p4, %p113_p3 }
   0xc   : > { %p704_p7 = scmp.ge.s32.totalorder %s1004_s21, 1  ;;  %p199_p8 = scmp.lt.s32.totalorder %s1004_s21, 9 }
   0xe   : > { %p200_p9 = pnand %p704_p7, %p199_p8 }
   0xf   : > { %s708_s7 = sshll.u32 (!%p200_p9), %s1059_s22, 4  ;;  %s747_s9 = sshll.u32 (!%p200_p9), %s1059_s22, 6 }
  0x10   : > { %203 = sbr.rel (%p200_p9) target bundleno = 476 (0x1dc), region = 32  ;;  %p238_p10 = scmp.lt.s32.totalorder (!%p200_p9), %s708_s7, 127 }
  0x11   : > { %s544_s12 = scalar_lea.hbm (!%p200_p9), %s1263_s3, %s747_s9  ;;  %s902_s6 = scalar_lea.hbm (!%p200_p9), %s1263_s3, 512 }
  0x12   : > { %s547_s14 = sshll.u32 (!%p200_p9), %s544_s12, 4  ;;  %s548_s14 = int_to_ptr.hbm [resolvable:$true] %s547_s14 }
  0x13   : > { %s896_s17 = sshra.s32 (!%p200_p9), %s548_s14, 4  ;;  %s897_s17 = int_to_ptr.hbm [resolvable:$true] %s896_s17 }
  0x14   : > { %s898_s25 = scalar_lea.hbm (!%p200_p9), %s897_s17, 64  ;;  %p903_p0 = scmp.lt.s32.totalorder (!%p200_p9), %s897_s17, %s1263_s3 }
  0x15   : > { %v746_v0 = vld [vmem:[%s1261_s1 + $0x18] sm:$0xff]  ;;  %v745_v1 = vld [vmem:[%s1261_s1 + $0x10] sm:$0xff]  ;;  %s1275_s7 = smov (!%p238_p10, %s708_s7), 127  ;;  %v744_v2 = vld [vmem:[%s1261_s1 + $0x8] sm:$0xff]  ;;  %vm301_vm0 = vcmask 523264   ;;  %p899_p11 = scmp.ne.s32.totalorder %s897_s17, %s898_s25 }
  0x16   : > { %330 = vmatpush.bf16.msra.mxu0 %v746_v0  ;;  %795 = vmatpush.bf16.msra.mxu3 %v746_v0  ;;  %s709_s10 = sshll.u32 %s1275_s7, 3  ;;  %v743_v3 = vld [vmem:[%s1261_s1] sm:$0xff]  ;;  %v422_v16 = vld [vmem:[%s1262_s2 + $0x78] sm:$0xff]  ;;  %v421_v17 = vld [vmem:[%s1262_s2 + $0x70] sm:$0xff]  ;;  %p904_p1 = scmp.lt.s32.totalorder %s902_s6, %s898_s25 }
  0x17   : > { %s1101_s15 = scalar_lea.vmem %s1260_s0, %s709_s10  ;;  %423 = vmatpush.msra.mxu1 %v422_v16  ;;  %799 = vmatpush.msra.mxu2 %v422_v16  ;;  %v420_v18 = vld [vmem:[%s1262_s2 + $0x68] sm:$0xff]  ;;  %v419_v19 = vld [vmem:[%s1262_s2 + $0x60] sm:$0xff]  ;;  %v418_v20 = vld [vmem:[%s1262_s2 + $0x58] sm:$0xff]  ;;  %p900_p12 = pnand %p899_p11, %p1078_p5 }
  0x18   : > { %v245_v4 = vld [vmem:[%s1101_s15] sm:$0xff]  ;;  %v246_v5 = vld [vmem:[%s1101_s15 + $0x8] sm:$0xff]  ;;  %v247_v7 = vld [vmem:[%s1101_s15 + $0x10] sm:$0xff]  ;;  %p905_p2 = por %p904_p1, %p903_p0 }
  0x19   : > { %v261_v6 = vpack.c.bf16 %v246_v5, %v245_v4  ;;  %v248_v8 = vld [vmem:[%s1101_s15 + $0x18] sm:$0xff]  ;;  %v249_v10 = vld [vmem:[%s1101_s15 + $0x20] sm:$0xff]  ;;  %v250_v11 = vld [vmem:[%s1101_s15 + $0x28] sm:$0xff]  ;;  %424 = vmatpush.msra.mxu1 %v421_v17  ;;  %801 = vmatpush.msra.mxu2 %v421_v17  ;;  %p901_p13 = pneg %p900_p12 }
  0x1a   : > { %331 = vmatpush.bf16.msra.mxu0 %v745_v1  ;;  %796 = vmatpush.bf16.msra.mxu3 %v745_v1  ;;  %v262_v9 = vpack.c.bf16 %v248_v8, %v247_v7  ;;  %v263_v12 = vpack.c.bf16 %v250_v11, %v249_v10  ;;  %v255_v13 = vld [vmem:[%s1101_s15 + $0x50] sm:$0xff]  ;;  %v256_v14 = vld [vmem:[%s1101_s15 + $0x58] sm:$0xff]  ;;  %v416_v24 = vld [vmem:[%s1262_s2 + $0x48] sm:$0xff] }
  0x1b   : > { %v266_v15 = vpack.c.bf16 %v256_v14, %v255_v13  ;;  %425 = vmatpush.msra.mxu1 %v420_v18  ;;  %803 = vmatpush.msra.mxu2 %v420_v18  ;;  %v417_v21 = vld [vmem:[%s1262_s2 + $0x50] sm:$0xff]  ;;  %v252_v23 = vld [vmem:[%s1101_s15 + $0x38] sm:$0xff]  ;;  %v257_v25 = vld [vmem:[%s1101_s15 + $0x60] sm:$0xff]  ;;  %p906_p3 = pnand %p905_p2, %p901_p13 }
  0x1c   : > { %v251_v22 = vld [vmem:[%s1101_s15 + $0x30] sm:$0xff]  ;;  %v258_v26 = vld [vmem:[%s1101_s15 + $0x68] sm:$0xff]  ;;  %v415_v28 = vld [vmem:[%s1262_s2 + $0x40] sm:$0xff] }
  0x1d   : > { %426 = vmatpush.msra.mxu1 %v419_v19  ;;  %805 = vmatpush.msra.mxu2 %v419_v19  ;;  %v264_v27 = vpack.c.bf16 %v252_v23, %v251_v22  ;;  %v267_v29 = vpack.c.bf16 %v258_v26, %v257_v25  ;;  %v414_v30 = vld [vmem:[%s1262_s2 + $0x38] sm:$0xff]  ;;  %v413_v31 = vld [vmem:[%s1262_s2 + $0x30] sm:$0xff]  ;;  %v412_v32 = vld [vmem:[%s1262_s2 + $0x28] sm:$0xff] }
  0x1e   : > { %332 = vmatpush.bf16.msra.mxu0 %v744_v2  ;;  %797 = vmatpush.bf16.msra.mxu3 %v744_v2  ;;  %v411_v33 = vld [vmem:[%s1262_s2 + $0x20] sm:$0xff]  ;;  %v410_v34 = vld [vmem:[%s1262_s2 + $0x18] sm:$0xff]  ;;  %v409_v35 = vld [vmem:[%s1262_s2 + $0x10] sm:$0xff] }
  0x1f   : > { %427 = vmatpush.msra.mxu1 %v418_v20  ;;  %807 = vmatpush.msra.mxu2 %v418_v20  ;;  %v253_v36 = vld [vmem:[%s1101_s15 + $0x40] sm:$0xff]  ;;  %v254_v37 = vld [vmem:[%s1101_s15 + $0x48] sm:$0xff]  ;;  %v259_v39 = vld [vmem:[%s1101_s15 + $0x70] sm:$0xff] }
  0x20   : > { %v408_v38 = vld [vmem:[%s1262_s2 + $0x8] sm:$0xff]  ;;  %v260_v40 = vld [vmem:[%s1101_s15 + $0x78] sm:$0xff]  ;;  %v265_v41 = vpack.c.bf16 %v254_v37, %v253_v36  ;;  %v407_v43 = vld [vmem:[%s1262_s2] sm:$0xff]  ;;  %s1179_s15 = sand.u32 1, %s996_s19  }
  0x21   : > { %428 = vmatpush.msra.mxu1 %v417_v21  ;;  %809 = vmatpush.msra.mxu2 %v417_v21  ;;  %v268_v42 = vpack.c.bf16 %v260_v40, %v259_v39  ;;  %s705_s7 = sshll.u32 %s1179_s15, 6  ;;  %s523_s16 = scalar_lea.sflag [#allocation3], %s1179_s15 }
  0x22   : > { %333 = vmatpush.bf16.msra.mxu0 %v743_v3  ;;  %798 = vmatpush.bf16.msra.mxu3 %v743_v3  ;;  %s1182_s8 = scalar_lea.vmem [#allocation2], %s705_s7 }
  0x23   : > { %429 = vmatpush.msra.mxu1 %v416_v24  ;;  %811 = vmatpush.msra.mxu2 %v416_v24  ;;  %s545_s13 = sshll.u32 %s1182_s8, 4  ;;  %s546_s13 = int_to_ptr.vmem [resolvable:$true] %s545_s13 }
  0x25   : > { %726 = vmatmul.msk.bf16.vlgmr.msra.gmra.mxu0 %vm301_vm0, %v261_v6  ;;  %731 = vmatmul.msk.bf16.vlgmr.msra.gmra.mxu3 %vm301_vm0, %v266_v15 }
  0x26   : > { %800 = vmatpush.msrb.mxu3 %v422_v16  ;;  %430 = vmatpush.msra.mxu1 %v415_v28 }
  0x27   : > { %813 = vmatpush.msra.mxu2 %v415_v28 }
  0x28   : > { %802 = vmatpush.msrb.mxu3 %v421_v17  ;;  %431 = vmatpush.msra.mxu1 %v414_v30 }
  0x29   : > { %815 = vmatpush.msra.mxu2 %v414_v30 }
  0x2a   : > { %804 = vmatpush.msrb.mxu3 %v420_v18  ;;  %432 = vmatpush.msra.mxu1 %v413_v31 }
  0x2b   : > { %817 = vmatpush.msra.mxu2 %v413_v31 }
  0x2c   : > { %806 = vmatpush.msrb.mxu3 %v419_v19  ;;  %433 = vmatpush.msra.mxu1 %v412_v32 }
  0x2d   : > { %819 = vmatpush.msra.mxu2 %v412_v32 }
  0x2e   : > { %808 = vmatpush.msrb.mxu3 %v418_v20  ;;  %434 = vmatpush.msra.mxu1 %v411_v33 }
  0x2f   : > { %821 = vmatpush.msra.mxu2 %v411_v33 }
  0x30   : > { %810 = vmatpush.msrb.mxu3 %v417_v21  ;;  %435 = vmatpush.msra.mxu1 %v410_v34 }
  0x31   : > { %823 = vmatpush.msra.mxu2 %v410_v34 }
  0x32   : > { %812 = vmatpush.msrb.mxu3 %v416_v24  ;;  %436 = vmatpush.msra.mxu1 %v409_v35 }
  0x33   : > { %825 = vmatpush.msra.mxu2 %v409_v35 }
  0x34   : > { %814 = vmatpush.msrb.mxu3 %v415_v28  ;;  %437 = vmatpush.msra.mxu1 %v408_v38 }
  0x35   : > { %727 = vmatmul.msk.bf16.gmra.mxu0 %vm301_vm0, %v262_v9  ;;  %732 = vmatmul.msk.bf16.gmra.mxu3 %vm301_vm0, %v267_v29 }
  0x36   : > { %816 = vmatpush.msrb.mxu3 %v414_v30  ;;  %827 = vmatpush.msra.mxu2 %v408_v38 }
  0x37   : > { %438 = vmatpush.msra.mxu1 %v407_v43 }
  0x38   : > { %818 = vmatpush.msrb.mxu3 %v413_v31  ;;  %829 = vmatpush.msra.mxu2 %v407_v43 }
  0x3a   : > { %820 = vmatpush.msrb.mxu3 %v412_v32 }
  0x3c   : > { %822 = vmatpush.msrb.mxu3 %v411_v33 }
  0x3e   : > { %824 = vmatpush.msrb.mxu3 %v410_v34 }
  0x40   : > { %826 = vmatpush.msrb.mxu3 %v409_v35 }
  0x42   : > { %828 = vmatpush.msrb.mxu3 %v408_v38 }
  0x44   : > { %830 = vmatpush.msrb.mxu3 %v407_v43 }
  0x45   : > { %728 = vmatmul.msk.bf16.gmra.mxu0 %vm301_vm0, %v263_v12  ;;  %733 = vmatmul.msk.bf16.gmra.mxu3 %vm301_vm0, %v268_v42 }
  0x55   : > { %729 = vmatmul.msk.bf16.gmra.mxu0 %vm301_vm0, %v264_v27 }
  0x65   : > { %730 = vmatmul.msk.bf16.gmra.mxu0 %vm301_vm0, %v265_v41 }
  0xa2   : > { %v335_v44 = vpop.f32.mrf.mxu0 }
  0xa3   : > { %439 = vmatmul.f32.vlgmr.msra.gmra.mxu1 %v335_v44 }
  0xa8   : > { %v360_v52 = vpop.f32.mrf.mxu3 }
  0xaa   : > { %v337_v45 = vpop.f32.mrf.mxu0 }
  0xab   : > { %v751_v46 = vpack.c.bf16 %v337_v45, %v335_v44  ;;  %442 = vmatmul.f32.gmra.mxu1 %v337_v45 }
  0xad   : > { %752 = vst [vmem:[%s1182_s8] sm:$0xff] %v751_v46  }
  0xb0   : > { %v362_v55 = vpop.f32.mrf.mxu3 }
  0xb1   : > { %v776_v56 = vpack.c.bf16 %v362_v55, %v360_v52 }
  0xb2   : > { %v340_v47 = vpop.f32.mrf.mxu0 }
  0xb3   : > { %445 = vmatmul.f32.gmra.mxu1 %v340_v47  ;;  %792 = vst [vmem:[%s1182_s8 + $0x28] sm:$0xff] %v776_v56  }
  0xb8   : > { %v365_v58 = vpop.f32.mrf.mxu3 }
  0xba   : > { %v342_v48 = vpop.f32.mrf.mxu0 }
  0xbb   : > { %v756_v49 = vpack.c.bf16 %v342_v48, %v340_v47  ;;  %448 = vmatmul.f32.gmra.mxu1 %v342_v48 }
  0xbd   : > { %788 = vst [vmem:[%s1182_s8 + $0x8] sm:$0xff] %v756_v49  }
  0xc0   : > { %v367_v61 = vpop.f32.mrf.mxu3 }
  0xc1   : > { %v781_v62 = vpack.c.bf16 %v367_v61, %v365_v58 }
  0xc2   : > { %v345_v50 = vpop.f32.mrf.mxu0 }
  0xc3   : > { %451 = vmatmul.f32.gmra.mxu1 %v345_v50  ;;  %793 = vst [vmem:[%s1182_s8 + $0x30] sm:$0xff] %v781_v62  }
  0xc8   : > { %v370_v0 = vpop.f32.mrf.mxu3 }
  0xc9   : > { %481 = vmatmul.f32.vlgmr.msrb.gmra.mxu3 %v370_v0 }
  0xca   : > { %v347_v51 = vpop.f32.mrf.mxu0 }
  0xcb   : > { %v761_v53 = vpack.c.bf16 %v347_v51, %v345_v50  ;;  %454 = vmatmul.f32.gmra.mxu1 %v347_v51 }
  0xcd   : > { %789 = vst [vmem:[%s1182_s8 + $0x10] sm:$0xff] %v761_v53  }
  0xd0   : > { %v372_v2 = vpop.f32.mrf.mxu3 }
  0xd1   : > { %v786_v3 = vpack.c.bf16 %v372_v2, %v370_v0  ;;  %484 = vmatmul.f32.gmra.mxu3 %v372_v2 }
  0xd2   : > { %v350_v54 = vpop.f32.mrf.mxu0 }
  0xd3   : > { %457 = vmatmul.f32.gmra.mxu1 %v350_v54  ;;  %794 = vst [vmem:[%s1182_s8 + $0x38] sm:$0xff] %v786_v3  }
  0xda   : > { %v352_v57 = vpop.f32.mrf.mxu0 }
  0xdb   : > { %v766_v59 = vpack.c.bf16 %v352_v57, %v350_v54  ;;  %460 = vmatmul.f32.vlgmr.msra.gmra.mxu2 %v352_v57 }
  0xdd   : > { %790 = vst [vmem:[%s1182_s8 + $0x18] sm:$0xff] %v766_v59  }
  0xe2   : > { %v355_v60 = vpop.f32.mrf.mxu0 }
  0xe3   : > { %463 = vmatmul.f32.gmra.mxu2 %v355_v60 }
  0xea   : > { %v357_v63 = vpop.f32.mrf.mxu0 }
  0xeb   : > { %v771_v1 = vpack.c.bf16 %v357_v63, %v355_v60  ;;  %466 = vmatmul.f32.gmra.mxu2 %v357_v63 }
  0xed   : > { %791 = vst [vmem:[%s1182_s8 + $0x20] sm:$0xff] %v771_v1  }
  0xf3   : > { %469 = vmatmul.f32.gmra.mxu2 %v360_v52 }
  0xfb   : > { %472 = vmatmul.f32.gmra.mxu2 %v362_v55 }
 0x103   : > { %475 = vmatmul.f32.gmra.mxu2 %v365_v58 }
 0x10b   : > { %478 = vmatmul.f32.gmra.mxu2 %v367_v61 }
 0x120   : > { %v440_v4 = vpop.f32.mrf.mxu1 }
 0x121   : > { %488 = vxpose.xlu0.b32.start [1/16] (narrow) %v440_v4, 16 }
 0x128   : > { %v443_v5 = vpop.f32.mrf.mxu1 }
 0x129   : > { %489 = vxpose.xlu0.b32.cont [2/16] (narrow) %v443_v5, 16 }
 0x130   : > { %v446_v6 = vpop.f32.mrf.mxu1 }
 0x131   : > { %490 = vxpose.xlu0.b32.cont [3/16] (narrow) %v446_v6, 16 }
 0x138   : > { %v449_v7 = vpop.f32.mrf.mxu1 }
 0x139   : > { %491 = vxpose.xlu0.b32.cont [4/16] (narrow) %v449_v7, 16 }
 0x140   : > { %v452_v8 = vpop.f32.mrf.mxu1 }
 0x141   : > { %492 = vxpose.xlu0.b32.cont [5/16] (narrow) %v452_v8, 16 }
 0x148   : > { %v455_v9 = vpop.f32.mrf.mxu1 }
 0x149   : > { %493 = vxpose.xlu0.b32.cont [6/16] (narrow) %v455_v9, 16 }
 0x150   : > { %v458_v10 = vpop.f32.mrf.mxu1 }
 0x151   : > { %494 = vxpose.xlu0.b32.cont [7/16] (narrow) %v458_v10, 16 }
 0x152   : > { %909 = shalt.err (!%p906_p3)
}
 0x153   : > { %s1006_s8 = smov 64   ;;  %s1007_s9 = smov 4   ;;  %v482_v18 = vpop.f32.mrf.mxu3 }
 0x154   : > { %831 = dma.vmem_to_hbm [thread:$0]  (%p1078_p5), %s546_s13, 1024, %s548_s14, %s523_s16, %s1006_s8, %s1006_s8, %s1007_s9  }
 0x155   : > { %s739_s23 = sshll.u32 %s1059_s22, 3  ;;  %s706_s10 = sshll.u32 %s1179_s15, 3 }
 0x156   : > { %s560_s13 = scalar_lea.hbm %s1264_s4, %s739_s23  ;;  %s229_s14 = scalar_lea.vmem [#allocation4], %s706_s10 }
 0x157   : > { %s562_s16 = sshll.u32 %s229_s14, 4  ;;  %s527_s17 = sand.u32 1, %s1059_s22   ;;  %s563_s16 = int_to_ptr.vmem [resolvable:$true] %s562_s16 }
 0x158   : > { %s564_s25 = sshll.u32 %s560_s13, 4  ;;  %s574_s6 = scalar_lea.hbm %s1265_s5, %s739_s23  ;;  %s565_s25 = int_to_ptr.hbm [resolvable:$true] %s564_s25 }
 0x159   : > { %s1217_s7 = scalar_lea.sflag [#allocation5], %s527_s17  ;;  %s924_s15 = sshra.s32 %s565_s25, 4  ;;  %s925_s15 = int_to_ptr.hbm [resolvable:$true] %s924_s15 }
 0x15a   : > { %s926_s8 = scalar_lea.hbm %s925_s15, 8  ;;  %s930_s11 = scalar_lea.hbm %s1264_s4, 64 }
 0x15b   : > { %v485_v19 = vpop.f32.mrf.mxu3  ;;  %p927_p4 = scmp.ne.s32.totalorder %s925_s15, %s926_s8  ;;  %p931_p9 = scmp.lt.s32.totalorder %s925_s15, %s1264_s4 }
 0x15c   : > { %p932_p10 = scmp.lt.s32.totalorder %s930_s11, %s926_s8 }
 0x15d   : > { %p928_p7 = pnand %p927_p4, %p1078_p5 }
 0x15e   : > { %v461_v11 = vpop.f32.mrf.mxu2  ;;  %p933_p11 = por %p932_p10, %p931_p9 }
 0x15f   : > { %495 = vxpose.xlu0.b32.cont [8/16] (narrow) %v461_v11, 16  ;;  %p929_p8 = pneg %p928_p7 }
 0x161   : > { %p934_p12 = pnand %p933_p11, %p929_p8 }
 0x166   : > { %v464_v12 = vpop.f32.mrf.mxu2 }
 0x167   : > { %496 = vxpose.xlu0.b32.cont [9/16] (narrow) %v464_v12, 16 }
 0x16e   : > { %v467_v13 = vpop.f32.mrf.mxu2 }
 0x16f   : > { %497 = vxpose.xlu0.b32.cont [10/16] (narrow) %v467_v13, 16 }
 0x176   : > { %v470_v14 = vpop.f32.mrf.mxu2 }
 0x177   : > { %498 = vxpose.xlu0.b32.cont [11/16] (narrow) %v470_v14, 16 }
 0x17e   : > { %v473_v15 = vpop.f32.mrf.mxu2 }
 0x17f   : > { %499 = vxpose.xlu0.b32.cont [12/16] (narrow) %v473_v15, 16 }
 0x186   : > { %v476_v16 = vpop.f32.mrf.mxu2 }
 0x187   : > { %500 = vxpose.xlu0.b32.cont [13/16] (narrow) %v476_v16, 16 }
 0x18e   : > { %v479_v17 = vpop.f32.mrf.mxu2 }
 0x18f   : > { %501 = vxpose.xlu0.b32.cont [14/16] (narrow) %v479_v17, 16 }
 0x197   : > { %502 = vxpose.xlu0.b32.cont [15/16] (narrow) %v482_v18, 16 }
 0x19f   : > { %503 = vxpose.xlu0.b32.end [16/16] (narrow) %v485_v19, 16 }
 0x1cb   : > { %v504_v20 = vpop.trf.xlu0 }
 0x1cc   : > { %520 = vst [vmem:[%s229_s14] sm:$0xff] %v504_v20 }
 0x1cd   : > { %937 = shalt.err (!%p934_p12)
}
 0x1ce   : > { %832 = dma.vmem_to_hbm [thread:$0]  (%p1078_p5), %s563_s16, 128, %s565_s25, %s1217_s7  }
 0x1cf   : > { %s236_s23 = scalar_lea.vmem [#allocation6], %s706_s10  ;;  %s578_s17 = sshll.u32 %s574_s6, 4  ;;  %s579_s17 = int_to_ptr.hbm [resolvable:$true] %s578_s17 }
 0x1d0   : > { %s576_s14 = sshll.u32 %s236_s23, 4  ;;  %s952_s26 = sshra.s32 %s579_s17, 4  ;;  %s577_s14 = int_to_ptr.vmem [resolvable:$true] %s576_s14  ;;  %s953_s26 = int_to_ptr.hbm [resolvable:$true] %s952_s26 }
 0x1d1   : > { %s954_s30 = scalar_lea.hbm %s953_s26, 8  ;;  %s958_s9 = scalar_lea.hbm %s1265_s5, 64 }
 0x1d2   : > { %p955_p13 = scmp.ne.s32.totalorder %s953_s26, %s954_s30  ;;  %p959_p2 = scmp.lt.s32.totalorder %s953_s26, %s1265_s5 }
 0x1d3   : > { %v505_v21 = vpop.trf.xlu0  ;;  %p960_p3 = scmp.lt.s32.totalorder %s958_s9, %s954_s30 }
 0x1d4   : > { %521 = vst [vmem:[%s236_s23] sm:$0xff] %v505_v21  ;;  %p956_p0 = pnand %p955_p13, %p1078_p5 }
 0x1d5   : > { %p961_p4 = por %p960_p3, %p959_p2 }
 0x1d6   : > { %p957_p1 = pneg %p956_p0 }
 0x1d8   : > { %p962_p7 = pnand %p961_p4, %p957_p1 }
 0x1da   : > { %965 = shalt.err (!%p962_p7)
}
 0x1db   : > { %833 = dma.vmem_to_hbm [thread:$0]  (%p1078_p5), %s577_s14, 128, %s579_s17, %s1217_s7  }
 0x1dc PF: > { %p847_p8 = scmp.ge.s32.totalorder %s1004_s21, 2  ;;  %s590_s10 = sand.u32 1, %s992_s18  }
 0x1dd   : > { %s591_s25 = scalar_lea.sflag [#allocation3], %s590_s10 }
 0x1de   : > { %p838_p9 = pnand %p847_p8, %p1082_p6 }
 0x1e0   : > { %p839_p10 = pneg %p838_p9 }
 0x1e2   : > { %983 = dma.done.wait (%p839_p10), %s591_s25, 1024  }
 0x1e3   : > { %985 = vsyncadd (%p839_p10), %s591_s25, 4294966272  ;;  %s1269_s6 = sadd.s32 4294967294, %s1004_s21  }
 0x1e4   : > { %s600_s11 = sand.u32 1, %s1269_s6  }
 0x1e5   : > { %s601_s12 = scalar_lea.sflag [#allocation5], %s600_s11 }
 0x1e6   : > { %987 = dma.done.wait (%p839_p10), %s601_s12, 256  }
 0x1e7   : > { %989 = vsyncadd (%p839_p10), %s601_s12, 4294967040  ;;  %p19_p5 = scmp.ge.s32.totalorder %s1063_s24, 10   ;;  %s1270_s18 = smov %s996_s19 }
 0x1e8   : > { %s1271_s19 = smov %s1000_s20  ;;  %s1272_s20 = smov %s1076_s27 }
 0x1e9   : > { %s1273_s21 = smov %s1063_s24  ;;  %21 = sbr.rel (!%p19_p5) target bundleno = 5 (0x5), region = 99 }
 0x1ee   :  { %617 = vsyncpa [#allocation3], 1 }
 0x1ef   :  { %619 = vsyncpa [#allocation3 + $0x1], 1 }
 0x1f0   :  { %620 = vsyncpa [#allocation5], 1 }
 0x1f1   :  { %622 = vsyncpa [#allocation5 + $0x1], 1 }

</bundles_post_ra>
